<compile_context>
chip_gen: v7x
topology: tpu7x:2x2x1
jax: 0.10.0
libtpu: 0.0.40
codegen_flags: <defaults>
</compile_context>

<pallas_src>
import math

import jax
import jax.numpy as jnp
from jax.experimental import pallas as pl
from jax.experimental.pallas import tpu as pltpu


def _predictor_kernel(x_ref, w_ref, mask_ref, o_ref):
    # x_ref:    (tm, D)  activation tile
    # w_ref:    (tn, D)  weight stripe (full T when num_types is small)
    # mask_ref: (tm, 1)  per-row pad mask
    # o_ref:    (tm, tn) output tile
    out = jax.lax.dot_general(
        x_ref[...],
        w_ref[...],
        dimension_numbers=(((1,), (1,)), ((), ())),  # contract D of x with D of w
        preferred_element_type=jnp.float32,
    )
    o_ref[...] = (out * mask_ref[...]).astype(o_ref.dtype)


def _round_up(x, m):
    return ((x + m - 1) // m) * m


def predictor_forward(data, non_pad_mask, weight, *, tm=None, compute_dtype=None):
    """data: (B, S, D); non_pad_mask: (B, S, 1); weight: (T, D).

    Returns (B, S, T) in data.dtype, matching
        nn.Linear(dim, num_types, bias=False)(data) * non_pad_mask.

    compute_dtype: optional (e.g. jnp.bfloat16) to halve HBM read traffic;
    accumulation is always f32.
    """
    B, S, D = data.shape
    T, D_w = weight.shape
    assert D_w == D, "weight must be (num_types, dim)"
    M = B * S

    in_dtype = jnp.dtype(compute_dtype) if compute_dtype is not None else jnp.dtype(data.dtype)
    out_dtype = jnp.dtype(data.dtype)

    x2d = data.reshape(M, D).astype(in_dtype)
    w = weight.astype(in_dtype)                          # (T, D), no host transpose
    m2d = non_pad_mask.reshape(M, 1).astype(jnp.float32)

    # ---- type-dim tiling: keep the whole weight resident unless T is large ----
    if T <= 1024:
        tn = T                 # full extent -> no (8,128) constraint issues
    else:
        tn = 512               # 128-aligned stripe for large num_types

    # ---- row-tile selection (bandwidth bound: big tiles, VMEM-capped) ----
    if tm is None:
        tm = 512
    tm = max(8, _round_up(min(tm, M), 8))

    # VMEM budget: double-buffered x / out / mask tiles + double-buffered weight stripe.
    vmem_budget = 20 * 1024 * 1024
    weight_bytes = 2 * tn * D * in_dtype.itemsize
    bytes_per_row = 2 * (D * in_dtype.itemsize + tn * out_dtype.itemsize + 4)
    max_tm = max(8, ((max(vmem_budget - weight_bytes, 0) // bytes_per_row) // 8) * 8)
    tm = max(8, min(tm, max_tm))

    # Keep >= 2 grid steps when there is enough work (v7x has 2 TensorCores).
    if M > 8 and pl.cdiv(M, tm) * pl.cdiv(T, tn) < 2:
        tm = max(8, _round_up(pl.cdiv(M, 2), 8))

    grid = (pl.cdiv(M, tm), pl.cdiv(T, tn))

    bytes_accessed = (
        M * D * in_dtype.itemsize * pl.cdiv(T, tn)   # activations (re-read per stripe)
        + T * D * in_dtype.itemsize                  # weight
        + M * 4                                      # mask
        + M * T * out_dtype.itemsize                 # output
    )

    out2d = pl.pallas_call(
        _predictor_kernel,
        out_shape=jax.ShapeDtypeStruct((M, T), out_dtype),
        grid_spec=pltpu.PrefetchScalarGridSpec(
            num_scalar_prefetch=0,
            grid=grid,
            in_specs=[
                pl.BlockSpec((tm, D), lambda i, j: (i, 0)),   # activation tile
                pl.BlockSpec((tn, D), lambda i, j: (j, 0)),   # weight stripe
                pl.BlockSpec((tm, 1), lambda i, j: (i, 0)),   # mask tile
            ],
            out_specs=pl.BlockSpec((tm, tn), lambda i, j: (i, j)),
        ),
        compiler_params=pltpu.CompilerParams(
            dimension_semantics=("parallel", "parallel"),
            vmem_limit_bytes=48 * 1024 * 1024,
        ),
        cost_estimate=pl.CostEstimate(
            flops=2 * M * D * T,
            transcendentals=0,
            bytes_accessed=bytes_accessed,
        ),
    )(x2d, w, m2d)

    return out2d.reshape(B, S, T)


if __name__ == "__main__":
    # Small shapes consistent with the THP Predictor forward.
    B, S, D, T = 2, 8, 32, 16  # batch, seq, hidden dim, num event types

    key = jax.random.PRNGKey(0)
    k_data, k_mask, k_w = jax.random.split(key, 3)

    data = jax.random.normal(k_data, (B, S, D), dtype=jnp.float32)
    # non-pad mask: 1.0 for valid positions, 0.0 for padded ones
    non_pad_mask = (jax.random.uniform(k_mask, (B, S, 1)) > 0.25).astype(jnp.float32)

    # nn.Linear(dim, num_types, bias=False) weight: (num_types, dim), xavier_normal_.
    xavier_std = math.sqrt(2.0 / (D + T))
    weight = xavier_std * jax.random.normal(k_w, (T, D), dtype=jnp.float32)

    # ---- full-precision run (matches the PyTorch module numerics) ----
    out = predictor_forward(data, non_pad_mask, weight)
    out = jax.block_until_ready(out)

    ref = (data @ weight.T) * non_pad_mask
    assert out.shape == (B, S, T)
    assert jnp.allclose(out, ref, atol=1e-5, rtol=1e-5)

    # ---- optional bf16-input run (halves HBM read traffic; f32 accumulate) ----
    out_bf16 = predictor_forward(data, non_pad_mask, weight, compute_dtype=jnp.bfloat16)
    out_bf16 = jax.block_until_ready(out_bf16)
    assert jnp.allclose(out_bf16, ref, atol=5e-2, rtol=5e-2)

    print("KERNEL_OK")
</pallas_src>

<mosaic_0001>
module attributes {stable_mosaic.version = 11 : i64} {
  func.func @_predictor_kernel(%arg0: i32, %arg1: i32, %arg2: memref<8x32xf32, #tpu.memory_space<vmem>>, %arg3: memref<16x32xf32, #tpu.memory_space<vmem>>, %arg4: memref<8x1xf32, #tpu.memory_space<vmem>>, %arg5: memref<8x16xf32, #tpu.memory_space<vmem>>) attributes {dimension_semantics = [#tpu.dimension_semantics<parallel>, #tpu.dimension_semantics<parallel>], iteration_bounds = array<i64: 2, 1>, scalar_prefetch = 0 : i64, scratch_operands = 0 : i64, tpu.core_type = #tpu.core_type<tc>, window_params = [{transform_indices = @transform_0, window_bounds = array<i64: 8, 32>}, {transform_indices = @transform_1, window_bounds = array<i64: 16, 32>}, {transform_indices = @transform_2, window_bounds = array<i64: 8, 1>}, {transform_indices = @transform_3, window_bounds = array<i64: 8, 16>}]} {
    %c0 = arith.constant 0 : index
    %c0_0 = arith.constant 0 : index
    %0 = vector.load %arg2[%c0, %c0_0] : memref<8x32xf32, #tpu.memory_space<vmem>>, vector<8x32xf32>
    %c0_1 = arith.constant 0 : index
    %c0_2 = arith.constant 0 : index
    %1 = vector.load %arg3[%c0_1, %c0_2] : memref<16x32xf32, #tpu.memory_space<vmem>>, vector<16x32xf32>
    %cst = arith.constant dense<0.000000e+00> : vector<8x16xf32>
    %2 = tpu.matmul %0, %1, %cst {dimension_numbers = #tpu.dot_dimension_numbers<[1], [1], [0], [0], [0, 0, 1, 0], [], []>} : vector<8x32xf32>, vector<16x32xf32>, vector<8x16xf32> -> vector<8x16xf32>
    %c0_3 = arith.constant 0 : index
    %c0_4 = arith.constant 0 : index
    %3 = vector.load %arg4[%c0_3, %c0_4] : memref<8x1xf32, #tpu.memory_space<vmem>>, vector<8x1xf32>
    %4 = vector.broadcast %3 : vector<8x1xf32> to vector<8x16xf32>
    %5 = arith.mulf %2, %4 : vector<8x16xf32>
    %c0_5 = arith.constant 0 : index
    %c0_6 = arith.constant 0 : index
    %6 = vector.load %arg5[%c0_5, %c0_6] : memref<8x16xf32, #tpu.memory_space<vmem>>, vector<8x16xf32>
    tpu.vector_store %arg5[%c0_5, %c0_6], %5 {strides = array<i32>} : memref<8x16xf32, #tpu.memory_space<vmem>>, vector<8x16xf32>,
    return
  }
  func.func @transform_0(%arg0: i32, %arg1: i32) -> (i32, i32) {
    %c0_i32 = arith.constant 0 : i32
    %c0_i32_0 = arith.constant 0 : i32
    return %arg0, %c0_i32 : i32, i32
  }
  func.func @transform_1(%arg0: i32, %arg1: i32) -> (i32, i32) {
    %c0_i32 = arith.constant 0 : i32
    %c0_i32_0 = arith.constant 0 : i32
    return %arg1, %c0_i32 : i32, i32
  }
  func.func @transform_2(%arg0: i32, %arg1: i32) -> (i32, i32) {
    %c0_i32 = arith.constant 0 : i32
    %c0_i32_0 = arith.constant 0 : i32
    return %arg0, %c0_i32 : i32, i32
  }
  func.func @transform_3(%arg0: i32, %arg1: i32) -> (i32, i32) {
    %c0_i32 = arith.constant 0 : i32
    return %arg0, %arg1 : i32, i32
  }
}

</mosaic_0001>

<bundles_post_ra>
// kernel: tpu_custom_call.1
= control target key start
LH: loop header
LB: loop body
LE: loop exit
PB: predicated region body
PF: predicated region fallthrough
CT: control target
= control target key end

     0   :  { %8 = vsyncpa [#allocation3], 0  ;;  %s819_s0 = inlined_call_operand.vmem [shape: f32[16,32], index: 0, kind: input, shape index: {}]   ;;  %s820_s1 = inlined_call_operand.hbm [shape: f32[16,32], index: 1, kind: input, shape index: {}]   ;;  %s821_s2 = inlined_call_operand.vmem [shape: f32[16,1], index: 2, kind: input, shape index: {}]   ;;  %s822_s3 = inlined_call_operand.hbm [shape: f32[16,16], index: 3, kind: output, shape index: {}]  }
   0x1   :  { %9 = vsyncpa [#allocation4], 0 }
   0x2   :  { %11 = vsyncpa [#allocation4 + $0x1], 0  ;;  %s666_s12 = smov 0   ;;  %s668_s13 = smov 0  }
   0x3   :  { %s670_s14 = smov 0   ;;  %s672_s15 = smov 0  }
   0x4   :  { %s674_s16 = smov 0   ;;  %s676_s17 = smov 0  }
   0x5 LB: > { %s422_s18 = sadd.s32 4294967295, %s636_s17   ;;  %s423_s19 = sadd.s32 4294967294, %s636_s17   ;;  %s636_s17 = sphi %s676_s17, %s17_s17   ;;  %s632_s16 = sphi %s674_s16, %s840_s16   ;;  %s628_s15 = sphi %s672_s15, %s839_s15   ;;  %s624_s14 = sphi %s670_s14, %s838_s14   ;;  %s620_s13 = sphi %s668_s13, %s837_s13   ;;  %s616_s12 = sphi %s666_s12, %s836_s12  }
   0x6   : > { %s29_s20 = sadd.s32 1, %s632_s16  ;;  %s116_s21 = sadd.s32 1, %s624_s14 }
   0x7   : > { %p31_p0 = scmp.ge.s32.totalorder %s29_s20, 2  ;;  %p126_p1 = scmp.ne.s32.totalorder %s624_s14, %s620_s13 }
   0x8   : > { %p127_p2 = scmp.eq.s32.totalorder %s422_s18, 1  ;;  %p132_p3 = scmp.ne.s32.totalorder %s620_s13, %s616_s12 }
   0x9   : > { %s842_s20 = smov (%p31_p0, %s29_s20), 0  ;;  %p133_p5 = scmp.eq.s32.totalorder %s423_s19, 1 }
   0xa   : > { %p706_p4 = por %p127_p2, %p126_p1  ;;  %s111_s23 = ssub.s32 %s632_s16, %s842_s20 }
   0xb   : > { %p424_p6 = scmp.ge.s32.totalorder %s636_s17, 1  ;;  %p114_p7 = scmp.eq.s32.totalorder %s111_s23, 0 }
   0xc   : > { %s827_s22 = scalar_select %p706_p4, 1, 0 }
   0xd   : > { %p713_p8 = por %p133_p5, %p132_p3  ;;  %p140_p9 = scmp.lt.s32.totalorder %s636_s17, 3 }
   0xe   : > { %s719_s25 = scalar_select %p114_p7, %s624_s14, %s116_s21  }
   0xf   : > { %s828_s24 = scalar_select %p713_p8, 1, 0 }
  0x10   : > { %p721_p10 = pnand %p424_p6, %p140_p9  ;;  %p725_p11 = scmp.eq.s32.totalorder %s422_s18, 0 }
  0x11   : > { %s638_s28 = smov [#allocation2]   ;;  %s526_s6 = scalar_lea.hbm %s820_s1, 256 }
  0x12   : > { %s829_s26 = scalar_select %p721_p10, 1, 0 }
  0x13   : > { %s830_s27 = scalar_select %p725_p11, 1, 0 }
  0x14   : > { %p459_p12 = pneg %p721_p10  ;;  %s155_s29 = sshll.u32 %s638_s28, 4  ;;  %s156_s29 = int_to_ptr.vmem [resolvable:$true] %s155_s29 }
  0x15   : > { %p527_p0 = scmp.ne.s32.totalorder %s820_s1, %s526_s6  ;;  %p533_p5 = scmp.lt.u32.totalorder %s526_s6, %s820_s1 }
  0x16   : > { %p733_p13 = pnand %p725_p11, %p459_p12 }
  0x18   : > { %p528_p1 = pneg %p733_p13 }
  0x1a   : > { %p529_p2 = pnand %p528_p1, %p527_p0 }
  0x1c   : > { %p530_p3 = pneg %p529_p2 }
  0x1e   : > { %p535_p6 = pnand %p533_p5, %p530_p3 }
  0x20   : > { %538 = shalt.err (!%p535_p6)
}
  0x21   : > { %s539_s11 = scalar_lea.vmem %s156_s29, 256  ;;  %p547_p8 = scmp.lt.s32.totalorder %s156_s29, %s156_s29 }
  0x22   : > { %p540_p7 = scmp.ne.s32.totalorder %s156_s29, %s539_s11  ;;  %p548_p4 = scmp.lt.s32.totalorder %s539_s11, %s539_s11 }
  0x24   : > { %p542_p9 = pnand %p540_p7, %p528_p1  ;;  %p549_p11 = por %p548_p4, %p547_p8 }
  0x26   : > { %p543_p12 = pneg %p542_p9 }
  0x28   : > { %p550_p10 = pnand %p549_p11, %p543_p12 }
  0x2a   : > { %553 = shalt.err (!%p550_p10)
}
  0x2b   : > { %s639_s18 = smov 128   ;;  %s640_s19 = smov 8  }
  0x2c   : > { %462 = dma.hbm_to_vmem [thread:$0]  (!%p733_p13), %s820_s1, 256, %s156_s29, [#allocation3], %s639_s18, %s639_s18, %s640_s19  }
  0x2d   : > { %p832_p0 = scmp.ne.s32.totalorder %s829_s26, 0 }
  0x2e   : > { %p833_p2 = scmp.ne.s32.totalorder (!%p832_p0), %s830_s27, 0 }
  0x2f   : > { %185 = sbr.rel (%p832_p0) target bundleno = 294 (0x126), region = 32 }
  0x36   : > { %607 = dma.done.wait (%p833_p2), [#allocation3], 256  }
  0x37   : > { %609 = vsyncadd (%p833_p2), [#allocation3], 4294967040  ;;  %v641_v0 = vmov 0.0|0.0   ;;  %vm642_vm0 = vmmov 0   ;;  %v643_v1 = vmov 0.0   ;;  %p212_p4 = scmp.lt.s32.totalorder %s628_s15, 1 }
  0x38   : > { %449 = vmatprep.subr.bf16.mxu0 %v641_v0  ;;  %446 = vmatprep.mubr.msk.f32.mxu0 %vm642_vm0, %v643_v1  ;;  %v644_v2 = vmov 0   ;;  %vm224_vm1 = vcmask 261120   ;;  %v222_v3 = vld [vmem:[#allocation2] sm:$0xff]  ;;  %v223_v4 = vld [vmem:[#allocation2 + $0x8] sm:$0xff]  ;;  %s209_s7 = sand.u32 1, %s620_s13   ;;  %s436_s9 = sshll.u32 %s628_s15, 7 }
  0x39   : > { %525 = vset.pattern.permute.xlu0 %v644_v2  ;;  %s213_s28 = scalar_select %p212_p4, %s628_s15, 1  ;;  %vm451_vm2 = vmpackc.low %vm224_vm1, %vm224_vm1  ;;  %v450_v5 = vpack.c.bf16 %v223_v4, %v222_v3  ;;  %vm311_vm3 = vcmask 130048  }
  0x3a   : > { %s429_s8 = sshll.u32 %s209_s7, 3  ;;  %s772_s21 = scalar_lea.hbm %s822_s3, %s436_s9 }
  0x3b   : > { %s430_s26 = sshll.u32 %s213_s28, 3  ;;  %452 = vmatpush3.bf16.xpose.msk.msra.mxu0 %vm451_vm2, %v450_v5  ;;  %s211_s10 = scalar_lea.vmem [#allocation5], %s429_s8 }
  0x3c   : > { %s220_s27 = scalar_lea.vmem %s821_s2, %s430_s26  ;;  %s215_s6 = scalar_lea.vmem %s819_s0, %s430_s26 }
  0x3d   : > { %v304_v6 = vld [vmem:[%s220_s27] sm:$0xff]  ;;  %s328_s11 = sshll.u32 %s211_s10, 4  ;;  %s314_s23 = scalar_lea.sflag [#allocation4], %s209_s7  ;;  %s774_s11 = int_to_ptr.vmem [resolvable:$true] %s328_s11 }
  0x3e   : > { %307 = vperm.xlu0 %525, %v304_v6   ;;  %v221_v7 = vld [vmem:[%s215_s6] sm:$0xff]  ;;  %s554_s28 = scalar_lea.vmem %s774_s11, 128  ;;  %p834_p10 = scmp.ne.s32.totalorder %s827_s22, 0 }
  0x3f   : > { %p555_p8 = scmp.ne.s32.totalorder %s774_s11, %s554_s28  ;;  %s645_s15 = smov [#allocation5]  }
  0x40   : > { %s558_s26 = sshll.u32 %s645_s15, 4  ;;  %s559_s26 = int_to_ptr.vmem [resolvable:$false] %s558_s26 }
  0x41   : > { %p556_p11 = pnand %p555_p8, %p834_p10  ;;  %s560_s29 = scalar_lea.vmem %s559_s26, 256 }
  0x42   : > { %447 = vmatmul.mubr.msk.f32.vlgmr.msra.gmra.mrb[0].mxu0 %vm224_vm1, %v221_v7  ;;  %p561_p1 = scmp.lt.s32.totalorder %s774_s11, %s559_s26  ;;  %p562_p3 = scmp.lt.s32.totalorder %s560_s29, %s554_s28 }
  0x43   : > { %p557_p13 = pneg %p556_p11 }
  0x44   : > { %p563_p5 = por %p562_p3, %p561_p1 }
  0x46   : > { %p564_p6 = pnand %p563_p5, %p557_p13 }
  0xbd   : > { %v308_v8 = vpop.permute.xlu0 %307 }
 0x115   : > { %v300_v9 = vpop.f32.mrb[0].mxu0 }
 0x116   : > { %v310_v10 = vmul.f32 %v308_v8, %v300_v9  ;;  %v448_v11 = vpop.f32.mrb[1].mxu0 }
 0x118   : > { %312 = vst.msk [vmem:[%s211_s10] sm:$0xff] %vm311_vm3, %v310_v10 }
 0x119   : > { %567 = shalt.err (!%p564_p6)
}
 0x11a   : > { %s568_s30 = scalar_lea.hbm %s772_s21, 128  ;;  %s572_s5 = scalar_lea.hbm %s822_s3, 256 }
 0x11b   : > { %p569_p7 = scmp.ne.s32.totalorder %s772_s21, %s568_s30  ;;  %p573_p0 = scmp.lt.u32.totalorder %s772_s21, %s822_s3 }
 0x11c   : > { %p574_p2 = scmp.lt.u32.totalorder %s572_s5, %s568_s30  ;;  %p576_p8 = scmp.lt.u32.totalorder %s568_s30, %s772_s21 }
 0x11d   : > { %p570_p9 = pnand %p569_p7, %p834_p10 }
 0x11e   : > { %p575_p4 = por %p574_p2, %p573_p0 }
 0x11f   : > { %p571_p12 = pneg %p570_p9 }
 0x120   : > { %p577_p11 = por %p576_p8, %p575_p4 }
 0x122   : > { %p578_p13 = pnand %p577_p11, %p571_p12 }
 0x124   : > { %581 = shalt.err (!%p578_p13)
}
 0x125   : > { %457 = dma.vmem_to_hbm [thread:$0]  (%p834_p10), %s774_s11, 128, %s772_s21, %s314_s23  }
 0x126 PF: > { %p469_p1 = scmp.ge.s32.totalorder %s636_s17, 2  ;;  %s340_s8 = sand.u32 1, %s616_s12  }
 0x127   : > { %p835_p3 = scmp.ne.s32.totalorder %s828_s24, 0  ;;  %s341_s9 = scalar_lea.sflag [#allocation4], %s340_s8 }
 0x129   : > { %p464_p5 = pnand %p469_p1, %p835_p3 }
 0x12b   : > { %611 = dma.done.wait (!%p464_p5), %s341_s9, 128  }
 0x12c   : > { %613 = vsyncadd (!%p464_p5), %s341_s9, 4294967168  ;;  %s17_s17 = sadd.s32 1, %s636_s17   ;;  %s836_s12 = smov %s620_s13 }
 0x12d   : > { %p14_p6 = scmp.ge.s32.totalorder %s17_s17, 4   ;;  %s837_s13 = smov %s624_s14 }
 0x12e   : > { %s838_s14 = smov %s719_s25  ;;  %s839_s15 = smov %s632_s16 }
 0x12f   : > { %s840_s16 = smov %s842_s20  ;;  %16 = sbr.rel (!%p14_p6) target bundleno = 5 (0x5), region = 76 }
 0x136   :  { %346 = vsyncpa [#allocation3], 1 }
 0x137   :  { %348 = vsyncpa [#allocation3 + $0x1], 1 }
 0x138   :  { %349 = vsyncpa [#allocation4], 1 }
 0x139   :  { %351 = vsyncpa [#allocation4 + $0x1], 1 }

</bundles_post_ra>
